<compile_context>
chip_gen: v7x
topology: tpu7x:2x2x1
jax: 0.10.0
libtpu: 0.0.40
codegen_flags: <defaults>
</compile_context>

<pallas_src>
import functools

import jax
import jax.numpy as jnp
from jax.experimental import pallas as pl
from jax.experimental.pallas import tpu as pltpu

LN_EPS = 1e-5  # torch.nn.LayerNorm default


# --------------------------------------------------------------------------- #
# Kernel bodies
# --------------------------------------------------------------------------- #
def _layernorm_f32(x):
    # Two-pass LayerNorm statistics in f32 (matches PyTorch's LayerNorm and
    # avoids catastrophic cancellation of the one-pass E[x^2]-E[x]^2 form).
    mean = jnp.mean(x, axis=-1, keepdims=True)
    xc = x - mean
    var = jnp.mean(xc * xc, axis=-1, keepdims=True)
    return xc * jax.lax.rsqrt(var + LN_EPS)


def _quick_gelu(z):
    # z * sigmoid(1.702 z); keep the transcendental and the divide on the EUP
    # (exp + approximate reciprocal) instead of a multi-op f32 VPU divide.
    e = jnp.exp(-1.702 * z)
    return z * pl.reciprocal(1.0 + e, approx=True)


def _pooler_kernel_cached(x_ref, wt_ref, bias_ref, o_ref, xhat_ref, *, tb):
    # grid = (nj, ni): j (output-column tiles) is the OUTER, sequential axis;
    # i (batch tiles) is the INNER, parallel axis, so the weight tile streams
    # from HBM exactly once. xhat for every batch row is computed on the first
    # j-sweep and cached in VMEM scratch for the remaining column tiles.
    #   x_ref:    (tb, H_in)   token-0 rows (input dtype), only read at j == 0
    #   wt_ref:   (H_in, tn)   gamma-folded dense weight, (in, out), bf16
    #   bias_ref: (1, tn)      beta-folded dense bias, f32
    #   o_ref:    (tb, tn)     pooled-output tile
    #   xhat_ref: (ni*tb, H_in) bf16 scratch holding normalized rows
    j = pl.program_id(0)
    i = pl.program_id(1)
    row0 = pl.multiple_of(i * tb, tb)

    @pl.when(j == 0)
    def _():
        xhat = _layernorm_f32(x_ref[...].astype(jnp.float32))
        xhat_ref[pl.ds(row0, tb), :] = xhat.astype(xhat_ref.dtype)

    xhat = xhat_ref[pl.ds(row0, tb), :]
    z = jnp.dot(xhat, wt_ref[...], preferred_element_type=jnp.float32)
    z = z + bias_ref[...]
    o_ref[...] = _quick_gelu(z).astype(o_ref.dtype)


def _pooler_kernel_nocache(x_ref, wt_ref, bias_ref, o_ref):
    # Fallback: single output-column tile, or batch too large to cache xhat.
    xhat = _layernorm_f32(x_ref[...].astype(jnp.float32))
    z = jnp.dot(xhat.astype(wt_ref.dtype), wt_ref[...],
                preferred_element_type=jnp.float32)
    z = z + bias_ref[...]
    o_ref[...] = _quick_gelu(z).astype(o_ref.dtype)


# --------------------------------------------------------------------------- #
# Parameter preparation (one time, outside the hot path)
# --------------------------------------------------------------------------- #
def prepare_cross_pooler_params(params, matmul_dtype=jnp.bfloat16):
    """Fold LayerNorm affine into the dense layer and pre-transpose/cast once.

    y = xhat*gamma + beta ; z = y @ W^T + b
      = xhat @ (diag(gamma) W^T) + (beta @ W^T + b)
    The folded weight is stored as (in, out) bf16; results match the f32
    PyTorch module to ~1e-2 (intentional, documented).
    """
    w = params["dense_w"].astype(jnp.float32)        # (out, in) — nn.Linear layout
    b = params["dense_b"].astype(jnp.float32)        # (out,)
    gamma = params["ln_gamma"].astype(jnp.float32)   # (in,)
    beta = params["ln_beta"].astype(jnp.float32)     # (in,)
    out_f, in_f = w.shape
    wt_folded = (w.T * gamma[:, None]).astype(matmul_dtype)   # (in, out)
    bias_folded = (beta @ w.T + b).reshape(1, out_f)           # (1, out), f32
    return {"dense_wt": wt_folded, "dense_b": bias_folded,
            "in_features": in_f, "out_features": out_f}


# --------------------------------------------------------------------------- #
# Tile selection
# --------------------------------------------------------------------------- #
def _pick_batch_tile(b, h):
    tb = min(b, 256)
    # Keep the double-buffered f32 x tile under ~8 MiB for very large H.
    while tb > 8 and 2 * tb * h * 4 > (8 << 20):
        tb //= 2
    return tb


def _pick_out_tile(h):
    # Lane dim must be a multiple of 128 (or the full extent). Always split the
    # output axis when possible so the weight-column DMA pipelines with the MXU
    # and never ends up on a (1, 1) grid.
    if h % 128 != 0 or h < 256:
        return h
    best = h
    for tn in (1024, 512, 256, 128):
        if h % tn == 0:
            best = tn
            # Largest tn giving >= 4 column tiles while keeping the
            # double-buffered bf16 weight tile <= ~8 MiB.
            if h // tn >= 4 and 2 * h * tn * 2 <= (8 << 20):
                return tn
    return best


# --------------------------------------------------------------------------- #
# Wrapper
# --------------------------------------------------------------------------- #
def cross_pooler(hidden_states, hidden_mask, prepared):
    """Forward pass of CrossPooler.

    hidden_mask is accepted for API parity with the PyTorch module but is never
    read by the original forward either.
    """
    del hidden_mask
    B, S, H = hidden_states.shape
    wt = prepared["dense_wt"]            # (H_in, H_out), gamma-folded, bf16
    bias = prepared["dense_b"]           # (1, H_out), beta-folded, f32
    h_in, h_out = wt.shape
    assert h_in == H, (h_in, H)

    # LayerNorm is per-token, so LN(x)[:, 0] == LN(x[:, 0]); slice token 0 so
    # only B*H elements ever reach the kernel (instead of B*S*H).
    tok0 = hidden_states[:, 0, :]        # (B, H)

    tb = _pick_batch_tile(B, h_in)
    tn = _pick_out_tile(h_out)
    ni = pl.cdiv(B, tb)
    nj = pl.cdiv(h_out, tn)

    elt = jnp.dtype(hidden_states.dtype).itemsize
    cache_bytes = ni * tb * h_in * 2                     # bf16 xhat cache
    use_cache = (nj > 1) and (cache_bytes <= (8 << 20))

    est = (2 * h_in * tn * 2                             # weight double-buffer
           + 2 * tb * h_in * elt                         # x double-buffer
           + 2 * tb * tn * elt                           # out double-buffer
           + 2 * tn * 4                                  # bias
           + (cache_bytes if use_cache else 0))
    vmem_limit = int(min(max(est + (8 << 20), 16 << 20), 48 << 20))

    out_shape = jax.ShapeDtypeStruct((B, h_out), hidden_states.dtype)
    wt_spec = pl.BlockSpec((h_in, tn), lambda j, i: (0, j))
    bias_spec = pl.BlockSpec((1, tn), lambda j, i: (0, j))
    out_spec = pl.BlockSpec((tb, tn), lambda j, i: (i, j))

    if use_cache:
        # x is only consumed on the first j-sweep; pin its block index to 0
        # afterwards so Pallas elides the redundant DMAs across the inner loop.
        x_spec = pl.BlockSpec((tb, h_in),
                              lambda j, i: (jnp.where(j == 0, i, 0), 0))
        return pl.pallas_call(
            functools.partial(_pooler_kernel_cached, tb=tb),
            out_shape=out_shape,
            grid=(nj, ni),
            in_specs=[x_spec, wt_spec, bias_spec],
            out_specs=out_spec,
            scratch_shapes=[pltpu.VMEM((ni * tb, h_in), jnp.bfloat16)],
            compiler_params=pltpu.CompilerParams(
                dimension_semantics=("arbitrary", "parallel"),
                vmem_limit_bytes=vmem_limit),
        )(tok0, wt, bias)

    x_spec = pl.BlockSpec((tb, h_in), lambda j, i: (i, 0))
    return pl.pallas_call(
        _pooler_kernel_nocache,
        out_shape=out_shape,
        grid=(nj, ni),
        in_specs=[x_spec, wt_spec, bias_spec],
        out_specs=out_spec,
        compiler_params=pltpu.CompilerParams(
            dimension_semantics=("parallel", "parallel"),
            vmem_limit_bytes=vmem_limit),
    )(tok0, wt, bias)


# --------------------------------------------------------------------------- #
# Pure-JAX reference mirroring the PyTorch module (f32, unfolded params)
# --------------------------------------------------------------------------- #
def reference(hidden_states, params):
    x = hidden_states.astype(jnp.float32)
    mean = jnp.mean(x, axis=-1, keepdims=True)
    var = jnp.mean((x - mean) ** 2, axis=-1, keepdims=True)
    xhat = (x - mean) / jnp.sqrt(var + LN_EPS)
    y = xhat * params["ln_gamma"] + params["ln_beta"]
    pooled = y[:, 0]
    z = pooled @ params["dense_w"].T + params["dense_b"]
    return z * jax.nn.sigmoid(1.702 * z)


if __name__ == "__main__":
    def make_case(key, b, s, h):
        k_h, k_w, k_b, k_g, k_be = jax.random.split(key, 5)
        hidden_states = jax.random.normal(k_h, (b, s, h), dtype=jnp.float32)
        hidden_mask = jnp.ones((b, s), dtype=jnp.float32)   # unused by forward
        params = {
            "ln_gamma": 1.0 + 0.01 * jax.random.normal(k_g, (h,), dtype=jnp.float32),
            "ln_beta": 0.01 * jax.random.normal(k_be, (h,), dtype=jnp.float32),
            "dense_w": 0.05 * jax.random.normal(k_w, (h, h), dtype=jnp.float32),  # (out, in)
            "dense_b": 0.01 * jax.random.normal(k_b, (h,), dtype=jnp.float32),
        }
        return hidden_states, hidden_mask, params

    key = jax.random.PRNGKey(0)
    k1, k2 = jax.random.split(key)

    # Case 1: small module shapes (batch=2, seq=8, hidden=32) -> single-tile path.
    hs, mask, params = make_case(k1, 2, 8, 32)
    out = jax.block_until_ready(
        cross_pooler(hs, mask, prepare_cross_pooler_params(params)))
    ref = reference(hs, params)
    assert out.shape == (2, 32), out.shape
    err = float(jnp.max(jnp.abs(out - ref)))
    assert jnp.allclose(out, ref, atol=3e-2, rtol=3e-2), err

    # Case 2: hidden large enough to split the output axis -> exercises the
    # cached-LN / weight-resident-per-column-tile path (still small overall).
    hs, mask, params = make_case(k2, 8, 4, 512)
    out = jax.block_until_ready(
        cross_pooler(hs, mask, prepare_cross_pooler_params(params)))
    ref = reference(hs, params)
    assert out.shape == (8, 512), out.shape
    err = float(jnp.max(jnp.abs(out - ref)))
    assert jnp.allclose(out, ref, atol=3e-2, rtol=3e-2), err

    print("KERNEL_OK")
</pallas_src>

<mosaic_0001>
module attributes {stable_mosaic.version = 11 : i64} {
  func.func @_pooler_kernel_nocache(%arg0: i32, %arg1: i32, %arg2: memref<2x32xf32, #tpu.memory_space<vmem>>, %arg3: memref<32x32xbf16, #tpu.memory_space<vmem>>, %arg4: memref<1x32xf32, #tpu.memory_space<vmem>>, %arg5: memref<2x32xf32, #tpu.memory_space<vmem>>) attributes {dimension_semantics = [#tpu.dimension_semantics<parallel>, #tpu.dimension_semantics<parallel>], iteration_bounds = array<i64: 1, 1>, scalar_prefetch = 0 : i64, scratch_operands = 0 : i64, tpu.core_type = #tpu.core_type<tc>, window_params = [{transform_indices = @transform_0, window_bounds = array<i64: 2, 32>}, {transform_indices = @transform_1, window_bounds = array<i64: 32, 32>}, {transform_indices = @transform_2, window_bounds = array<i64: 1, 32>}, {transform_indices = @transform_3, window_bounds = array<i64: 2, 32>}]} {
    %c0 = arith.constant 0 : index
    %c0_0 = arith.constant 0 : index
    %0 = vector.load %arg2[%c0, %c0_0] : memref<2x32xf32, #tpu.memory_space<vmem>>, vector<2x32xf32>
    %cst = arith.constant dense<0.000000e+00> : vector<2xf32>
    %1 = vector.multi_reduction <add>, %0, %cst [1] : vector<2x32xf32> to vector<2xf32>
    %2 = vector.shape_cast %1 : vector<2xf32> to vector<2x1xf32>
    %cst_1 = arith.constant 3.200000e+01 : f32
    %3 = vector.broadcast %cst_1 : f32 to vector<2x1xf32>
    %4 = arith.divf %2, %3 : vector<2x1xf32>
    %5 = vector.broadcast %4 : vector<2x1xf32> to vector<2x32xf32>
    %6 = arith.subf %0, %5 : vector<2x32xf32>
    %7 = arith.mulf %6, %6 : vector<2x32xf32>
    %cst_2 = arith.constant dense<0.000000e+00> : vector<2xf32>
    %8 = vector.multi_reduction <add>, %7, %cst_2 [1] : vector<2x32xf32> to vector<2xf32>
    %9 = vector.shape_cast %8 : vector<2xf32> to vector<2x1xf32>
    %cst_3 = arith.constant 3.200000e+01 : f32
    %10 = vector.broadcast %cst_3 : f32 to vector<2x1xf32>
    %11 = arith.divf %9, %10 : vector<2x1xf32>
    %cst_4 = arith.constant 9.99999974E-6 : f32
    %12 = vector.broadcast %cst_4 : f32 to vector<2x1xf32>
    %13 = arith.addf %11, %12 : vector<2x1xf32>
    %14 = math.rsqrt %13 : vector<2x1xf32>
    %15 = vector.broadcast %14 : vector<2x1xf32> to vector<2x32xf32>
    %16 = arith.mulf %6, %15 : vector<2x32xf32>
    %17 = arith.truncf %16 : vector<2x32xf32> to vector<2x32xbf16>
    %c0_5 = arith.constant 0 : index
    %c0_6 = arith.constant 0 : index
    %18 = vector.load %arg3[%c0_5, %c0_6] : memref<32x32xbf16, #tpu.memory_space<vmem>>, vector<32x32xbf16>
    %cst_7 = arith.constant dense<0.000000e+00> : vector<2x32xf32>
    %19 = tpu.matmul %17, %18, %cst_7 {dimension_numbers = #tpu.dot_dimension_numbers<[1], [0], [0], [1], [0, 0, 1, 1], [], []>} : vector<2x32xbf16>, vector<32x32xbf16>, vector<2x32xf32> -> vector<2x32xf32>
    %c0_8 = arith.constant 0 : index
    %c0_9 = arith.constant 0 : index
    %20 = vector.load %arg4[%c0_8, %c0_9] : memref<1x32xf32, #tpu.memory_space<vmem>>, vector<1x32xf32>
    %21 = vector.broadcast %20 : vector<1x32xf32> to vector<2x32xf32>
    %22 = arith.addf %19, %21 : vector<2x32xf32>
    %cst_10 = arith.constant -1.702000e+00 : f32
    %23 = vector.broadcast %cst_10 : f32 to vector<2x32xf32>
    %24 = arith.mulf %23, %22 : vector<2x32xf32>
    %25 = math.exp %24 : vector<2x32xf32>
    %cst_11 = arith.constant 1.000000e+00 : f32
    %26 = vector.broadcast %cst_11 : f32 to vector<2x32xf32>
    %27 = arith.addf %26, %25 : vector<2x32xf32>
    %28 = tpu.reciprocal %27 {approx = true} : vector<2x32xf32> -> vector<2x32xf32>
    %29 = arith.mulf %22, %28 : vector<2x32xf32>
    %c0_12 = arith.constant 0 : index
    %c0_13 = arith.constant 0 : index
    %30 = vector.load %arg5[%c0_12, %c0_13] : memref<2x32xf32, #tpu.memory_space<vmem>>, vector<2x32xf32>
    tpu.vector_store %arg5[%c0_12, %c0_13], %29 {strides = array<i32>} : memref<2x32xf32, #tpu.memory_space<vmem>>, vector<2x32xf32>,
    return
  }
  func.func @transform_0(%arg0: i32, %arg1: i32) -> (i32, i32) {
    %c0_i32 = arith.constant 0 : i32
    %c0_i32_0 = arith.constant 0 : i32
    return %arg1, %c0_i32 : i32, i32
  }
  func.func @transform_1(%arg0: i32, %arg1: i32) -> (i32, i32) {
    %c0_i32 = arith.constant 0 : i32
    %c0_i32_0 = arith.constant 0 : i32
    return %c0_i32, %arg0 : i32, i32
  }
  func.func @transform_2(%arg0: i32, %arg1: i32) -> (i32, i32) {
    %c0_i32 = arith.constant 0 : i32
    %c0_i32_0 = arith.constant 0 : i32
    return %c0_i32, %arg0 : i32, i32
  }
  func.func @transform_3(%arg0: i32, %arg1: i32) -> (i32, i32) {
    %c0_i32 = arith.constant 0 : i32
    return %arg1, %arg0 : i32, i32
  }
}

</mosaic_0001>

<bundles_post_ra>
// kernel: tpu_custom_call.1
= control target key start
LH: loop header
LB: loop body
LE: loop exit
PB: predicated region body
PF: predicated region fallthrough
CT: control target
= control target key end

     0   :  { %8 = vsyncpa [#allocation3], 0  ;;  %s327_s0 = inlined_call_operand.hbm [shape: f32[2,32], index: 0, kind: input, shape index: {}]   ;;  %s328_s1 = inlined_call_operand.hbm [shape: bf16[32,32], index: 1, kind: input, shape index: {}]   ;;  %s329_s2 = inlined_call_operand.vmem [shape: f32[1,32], index: 2, kind: input, shape index: {}]   ;;  %s330_s3 = inlined_call_operand.hbm [shape: f32[2,32], index: 3, kind: output, shape index: {}]  }
   0x1   :  { %9 = vsyncpa [#allocation6], 0 }
   0x2   :  { %10 = vsyncpa [#allocation4], 0  ;;  %s251_s12 = smov [#allocation2]   ;;  %s252_s14 = smov [#allocation5]  }
   0x3   :  { %s17_s13 = sshll.u32 %s251_s12, 4  ;;  %s26_s15 = sshll.u32 %s252_s14, 4  ;;  %s18_s13 = int_to_ptr.vmem [resolvable:$true] %s17_s13  ;;  %s278_s15 = int_to_ptr.vmem [resolvable:$true] %s26_s15 }
   0x4   :  { %s179_s18 = scalar_lea.hbm %s327_s0, 32 }
   0x5   :  { %p180_p0 = scmp.ne.s32.totalorder %s327_s0, %s179_s18  ;;  %p183_p1 = scmp.lt.u32.totalorder %s179_s18, %s327_s0 }
   0x7   :  { %p185_p2 = pnand %p183_p1, %p180_p0 }
   0x9   :  { %188 = shalt.err (!%p185_p2)
}
   0xa   :  { %s189_s23 = scalar_lea.vmem %s18_s13, 32  ;;  %p194_p4 = scmp.lt.s32.totalorder %s18_s13, %s18_s13 }
   0xb   :  { %p190_p3 = scmp.ne.s32.totalorder %s18_s13, %s189_s23  ;;  %p195_p5 = scmp.lt.s32.totalorder %s189_s23, %s189_s23 }
   0xd   :  { %p196_p6 = por %p195_p5, %p194_p4 }
   0xf   :  { %p197_p7 = pnand %p196_p6, %p190_p3 }
  0x11   :  { %200 = shalt.err (!%p197_p7)
}
  0x12   :  { %20 = dma.hbm_to_vmem [thread:$0]  %s327_s0, 32, %s18_s13, [#allocation3]  }
  0x13   :  { %s201_s28 = scalar_lea.hbm %s328_s1, 256 }
  0x14   :  { %p202_p8 = scmp.ne.s32.totalorder %s328_s1, %s201_s28  ;;  %p205_p9 = scmp.lt.u32.totalorder %s201_s28, %s328_s1 }
  0x16   :  { %p207_p10 = pnand %p205_p9, %p202_p8 }
  0x18   :  { %210 = shalt.err (!%p207_p10)
}
  0x19   :  { %s211_s6 = scalar_lea.vmem %s278_s15, 256  ;;  %p216_p12 = scmp.lt.s32.totalorder %s278_s15, %s278_s15 }
  0x1a   :  { %p212_p11 = scmp.ne.s32.totalorder %s278_s15, %s211_s6  ;;  %p217_p13 = scmp.lt.s32.totalorder %s211_s6, %s211_s6 }
  0x1c   :  { %p218_p0 = por %p217_p13, %p216_p12 }
  0x1e   :  { %p219_p1 = pnand %p218_p0, %p212_p11 }
  0x20   :  { %222 = shalt.err (!%p219_p1)
}
  0x21   :  { %s253_s0 = smov 64   ;;  %s254_s7 = smov 4  }
  0x22   :  { %32 = dma.hbm_to_vmem [thread:$0]  %s328_s1, 256, %s278_s15, [#allocation6], %s253_s0, %s253_s0, %s254_s7  }
  0x23   :  { %245 = dma.done.wait [#allocation3], 32  }
  0x24   :  { %246 = vsyncadd [#allocation3], 4294967264 }
  0x25   :  { %247 = dma.done.wait [#allocation6], 256  }
  0x26   :  { %248 = vsyncadd [#allocation6], 4294967040  ;;  %vm43_vm0 = vcmask 254976   ;;  %v42_v0 = vld [vmem:[#allocation2] sm:$0x3]  ;;  %v171_v7 = vld [vmem:[#allocation5] sm:$0xff]  }
  0x27   :  { %v44_v1 = vsel %vm43_vm0, %v42_v0, 0.0  ;;  %v255_v8 = vmov 0.0   ;;  %vm256_vm1 = vmmov 0   ;;  %v172_v9 = vld [vmem:[#allocation5 + $0x8] sm:$0xff]   ;;  %vm82_vm2 = vcmask 261120   ;;  %s257_s11 = smov [#allocation7]  }
  0x28   :  { %45 = vadd.xlane.f32.xlu0 %v44_v1  ;;  %156 = vmatprep.subr.bf16.mxu0 %v255_v8  ;;  %v149_v16 = vld [vmem:[%s329_s2] ss:$0 sm:$0xff]  ;;  %s139_s12 = sshll.u32 %s257_s11, 4  ;;  %s140_s12 = int_to_ptr.vmem [resolvable:$true] %s139_s12 }
  0x29   :  { %160 = vmatprep.mubr.msk.bf16.mxu0 %vm256_vm1, %v255_v8  ;;  %157 = vmatpush3.bf16.msra.mxu0 %v171_v7  ;;  %s223_s13 = scalar_lea.vmem %s140_s12, 32  ;;  %p228_p3 = scmp.lt.s32.totalorder %s140_s12, %s140_s12 }
  0x2a   :  { %158 = vmatprep.subr.bf16.mxu0 %v255_v8  ;;  %p224_p2 = scmp.ne.s32.totalorder %s140_s12, %s223_s13  ;;  %p229_p4 = scmp.lt.s32.totalorder %s223_s13, %s223_s13 }
  0x2c   :  { %p230_p5 = por %p229_p4, %p228_p3 }
  0x2d   :  { %159 = vmatpush3.bf16.msra.mxu0 %v172_v9 }
  0x2e   :  { %p231_p6 = pnand %p230_p5, %p224_p2 }
  0xb5   :  { %v46_v2 = vpop.xlane.xlu0 %45 }
  0xb6   :  { %v48_v3 = vmul.f32 0.03125, %v46_v2 }
  0xb8   :  { %v49_v4 = vsub.f32 %v42_v0, %v48_v3 }
  0xba   :  { %v50_v5 = vmul.f32 %v49_v4, %v49_v4 }
  0xbc   :  { %v51_v6 = vsel %vm43_vm0, %v50_v5, 0.0 }
  0xbd   :  { %52 = vadd.xlane.f32.xlu0 %v51_v6 }
 0x14a   :  { %v53_v10 = vpop.xlane.xlu0 %52 }
 0x14b   :  { %v54_v11 = vmul.f32 0.03125, %v53_v10 }
 0x14d   :  { %v55_v12 = vadd.f32 1e-05, %v54_v11 }
 0x14f   :  { %173 = vrsqrt.f32 %v55_v12 }
 0x159   :  { %v174_v13 = vpop.eup %173 }
 0x15a   :  { %v57_v14 = vmul.f32 %v174_v13, %v49_v4 }
 0x15c   :  { %v58_v15 = vpack.c.bf16 %v57_v14, %v57_v14 }
 0x15e   :  { %161 = vmatmul.mubr.msk.bf16.vlgmr.msra.gmra.mrb[0].mxu0 %vm82_vm2, %v58_v15 }
 0x231   :  { %v120_v17 = vpop.f32.mrb[0].mxu0 }
 0x232   :  { %v121_v18 = vadd.f32 %v149_v16, %v120_v17  ;;  %v162_v19 = vpop.f32.mrb[1].mxu0 }
 0x233   :  { %v123_v20 = vpop.f32.mrb[2].mxu0 }
 0x234   :  { %v126_v21 = vmul.f32 -1.702, %v121_v18  ;;  %v163_v22 = vpop.f32.mrb[3].mxu0 }
 0x236   :  { %v127_v23 = vmul.f32 1.442695, %v126_v21 }
 0x238   :  { %175 = vpow2.f32 %v127_v23 }
 0x242   :  { %v176_v24 = vpop.eup %175 }
 0x243   :  { %v129_v25 = vadd.f32 1.0, %v176_v24 }
 0x245   :  { %177 = vrcp.f32 %v129_v25 }
 0x24f   :  { %v178_v26 = vpop.eup %177 }
 0x250   :  { %v131_v27 = vmul.f32 %v178_v26, %v121_v18 }
 0x252   :  { %132 = vst.msk [vmem:[#allocation7] sm:$0x3] %vm43_vm0, %v131_v27 }
 0x253   :  { %234 = shalt.err (!%p231_p6)
}
 0x254   :  { %s235_s15 = scalar_lea.hbm %s330_s3, 32 }
 0x255   :  { %p236_p7 = scmp.ne.s32.totalorder %s330_s3, %s235_s15  ;;  %p239_p8 = scmp.lt.u32.totalorder %s235_s15, %s330_s3 }
 0x257   :  { %p241_p9 = pnand %p239_p8, %p236_p7 }
 0x259   :  { %244 = shalt.err (!%p241_p9)
}
 0x25a   :  { %142 = dma.vmem_to_hbm [thread:$0]  %s140_s12, 32, %s330_s3, [#allocation4]  }
 0x25b   :  { %249 = dma.done.wait [#allocation4], 32  }
 0x25c   :  { %250 = vsyncadd [#allocation4], 4294967264 }
 0x25d   :  { %146 = vsyncpa [#allocation3], 1 }
 0x25e   :  { %147 = vsyncpa [#allocation6], 1 }
 0x25f   :  { %148 = vsyncpa [#allocation4], 1 }

</bundles_post_ra>
